<compile_context>
chip_gen: v6e
topology: v6e:2x2x1
jax: 0.10.0
libtpu: 0.0.40
codegen_flags: <defaults>
</compile_context>

<pallas_src>
import jax
import jax.numpy as jnp
from jax.experimental import pallas as pl
from jax.experimental.pallas import tpu as pltpu


def xor_mlp_kernel(params_ref, xt_ref, ot_ref):
    """Whole forward pass on one lane-dense tile.

    params_ref: SMEM f32[9] = [W1[0,0], W1[0,1], W1[1,0], W1[1,1],
                               b1[0], b1[1], W2[0,0], W2[0,1], b2[0]]
    xt_ref:     VMEM (2, TB)  feature-major input (batch on the lane axis)
    ot_ref:     VMEM (1, TB)  feature-major output
    """
    x0 = xt_ref[0:1, :]                      # (1, TB)
    x1 = xt_ref[1:2, :]                      # (1, TB)

    # Parameters as SMEM scalars -> scalar-immediate VPU multiplies/adds.
    w1_00 = params_ref[0]
    w1_01 = params_ref[1]
    w1_10 = params_ref[2]
    w1_11 = params_ref[3]
    b1_0 = params_ref[4]
    b1_1 = params_ref[5]
    w2_0 = params_ref[6]
    w2_1 = params_ref[7]
    b2 = params_ref[8]

    # Layer 1 + sigmoid: 2 FMAs + bias per hidden unit (VPU), sigmoid on EUP.
    h0 = jax.nn.sigmoid(x0 * w1_00 + x1 * w1_01 + b1_0)
    h1 = jax.nn.sigmoid(x0 * w1_10 + x1 * w1_11 + b1_1)

    # Layer 2: 2 FMAs + bias, stored as a full-lane (unmasked) row.
    ot_ref[...] = h0 * w2_0 + h1 * w2_1 + b2


def xor_forward(x, w1, b1, w2, b2, *, batch_tile=8192):
    """Forward pass of XorModel.

    x  : (B, 2) float32
    w1 : (2, 2), b1: (2,), w2: (1, 2), b2: (1,)   (PyTorch nn.Linear layout)
    Returns (B, 1) float32, identical semantics to the PyTorch module
    (y = sigmoid(x @ W1.T + b1) @ W2.T + b2).
    """
    B = x.shape[0]
    params = jnp.concatenate(
        [w1.reshape(-1), b1.reshape(-1), w2.reshape(-1), b2.reshape(-1)]
    ).astype(jnp.float32)                                  # (9,)
    xt = x.astype(jnp.float32).T                           # (2, B), batch on lanes

    use_grid = (B > batch_tile) and (B % batch_tile == 0) and (batch_tile % 128 == 0)

    if use_grid:
        # Large batch: tile the lane axis; params stay resident in SMEM for
        # every grid step; input/output tiles are double-buffered by Pallas.
        yt = pl.pallas_call(
            xor_mlp_kernel,
            out_shape=jax.ShapeDtypeStruct((1, B), jnp.float32),
            grid=(B // batch_tile,),
            in_specs=[
                pl.BlockSpec(memory_space=pltpu.MemorySpace.SMEM),
                pl.BlockSpec((2, batch_tile), lambda i: (0, i)),
            ],
            out_specs=pl.BlockSpec((1, batch_tile), lambda i: (0, i)),
            compiler_params=pltpu.CompilerParams(
                dimension_semantics=("parallel",),
            ),
        )(params, xt)
    else:
        # Small / non-tileable batch: single invocation, whole arrays in VMEM.
        yt = pl.pallas_call(
            xor_mlp_kernel,
            out_shape=jax.ShapeDtypeStruct((1, B), jnp.float32),
            in_specs=[
                pl.BlockSpec(memory_space=pltpu.MemorySpace.SMEM),
                pl.BlockSpec(memory_space=pltpu.MemorySpace.VMEM),
            ],
            out_specs=pl.BlockSpec(memory_space=pltpu.MemorySpace.VMEM),
        )(params, xt)

    return yt.T                                            # (B, 1)


def init_params(key):
    """Deterministic init matching nn.Linear's U(-1/sqrt(fan_in), 1/sqrt(fan_in)),
    stored in the PyTorch layout: W is (out_features, in_features)."""
    k1, k2, k3, k4 = jax.random.split(key, 4)
    bound = 1.0 / jnp.sqrt(2.0)          # fan_in = 2 for both layers
    w1 = jax.random.uniform(k1, (2, 2), jnp.float32, -bound, bound)
    b1 = jax.random.uniform(k2, (2,), jnp.float32, -bound, bound)
    w2 = jax.random.uniform(k3, (1, 2), jnp.float32, -bound, bound)
    b2 = jax.random.uniform(k4, (1,), jnp.float32, -bound, bound)
    return w1, b1, w2, b2


def xor_ref(x, w1, b1, w2, b2):
    """Pure-JAX reference of the PyTorch forward (x @ W.T + b)."""
    h = jax.nn.sigmoid(x @ w1.T + b1)
    return h @ w2.T + b2


if __name__ == "__main__":
    key = jax.random.PRNGKey(0)
    k_x, k_x2, k_p = jax.random.split(key, 3)
    w1, b1, w2, b2 = init_params(k_p)

    # Small-batch path (single invocation, no grid).
    batch = 8
    x = jax.random.uniform(k_x, (batch, 2), jnp.float32)
    y = xor_forward(x, w1, b1, w2, b2)
    jax.block_until_ready(y)
    assert y.shape == (batch, 1)
    assert jnp.allclose(y, xor_ref(x, w1, b1, w2, b2), atol=1e-5, rtol=1e-5)

    # Lane-tiled path (exercises the batch grid + double-buffering + megacore).
    big = 1024
    x_big = jax.random.uniform(k_x2, (big, 2), jnp.float32)
    y_big = xor_forward(x_big, w1, b1, w2, b2, batch_tile=256)
    jax.block_until_ready(y_big)
    assert y_big.shape == (big, 1)
    assert jnp.allclose(y_big, xor_ref(x_big, w1, b1, w2, b2), atol=1e-5, rtol=1e-5)

    print("KERNEL_OK")
</pallas_src>

<mosaic_0001>
module attributes {stable_mosaic.version = 11 : i64} {
  func.func @xor_mlp_kernel(%arg0: memref<9xf32, #tpu.memory_space<smem>>, %arg1: memref<2x8xf32, #tpu.memory_space<vmem>>, %arg2: memref<1x8xf32, #tpu.memory_space<vmem>>) attributes {dimension_semantics = [], scalar_prefetch = 0 : i64, scratch_operands = 0 : i64, tpu.core_type = #tpu.core_type<tc>} {
    %c0 = arith.constant 0 : index
    %c0_0 = arith.constant 0 : index
    %0 = vector.load %arg1[%c0, %c0_0] : memref<2x8xf32, #tpu.memory_space<vmem>>, vector<1x8xf32>
    %c1 = arith.constant 1 : index
    %c0_1 = arith.constant 0 : index
    %1 = vector.load %arg1[%c1, %c0_1] : memref<2x8xf32, #tpu.memory_space<vmem>>, vector<1x8xf32>
    %c0_2 = arith.constant 0 : index
    %2 = memref.load %arg0[%c0_2] : memref<9xf32, #tpu.memory_space<smem>>
    %c1_3 = arith.constant 1 : index
    %3 = memref.load %arg0[%c1_3] : memref<9xf32, #tpu.memory_space<smem>>
    %c2 = arith.constant 2 : index
    %4 = memref.load %arg0[%c2] : memref<9xf32, #tpu.memory_space<smem>>
    %c3 = arith.constant 3 : index
    %5 = memref.load %arg0[%c3] : memref<9xf32, #tpu.memory_space<smem>>
    %c4 = arith.constant 4 : index
    %6 = memref.load %arg0[%c4] : memref<9xf32, #tpu.memory_space<smem>>
    %c5 = arith.constant 5 : index
    %7 = memref.load %arg0[%c5] : memref<9xf32, #tpu.memory_space<smem>>
    %c6 = arith.constant 6 : index
    %8 = memref.load %arg0[%c6] : memref<9xf32, #tpu.memory_space<smem>>
    %c7 = arith.constant 7 : index
    %9 = memref.load %arg0[%c7] : memref<9xf32, #tpu.memory_space<smem>>
    %c8 = arith.constant 8 : index
    %10 = memref.load %arg0[%c8] : memref<9xf32, #tpu.memory_space<smem>>
    %11 = vector.broadcast %2 : f32 to vector<1x8xf32>
    %12 = arith.mulf %0, %11 : vector<1x8xf32>
    %13 = vector.broadcast %3 : f32 to vector<1x8xf32>
    %14 = arith.mulf %1, %13 : vector<1x8xf32>
    %15 = arith.addf %12, %14 : vector<1x8xf32>
    %16 = vector.broadcast %6 : f32 to vector<1x8xf32>
    %17 = arith.addf %15, %16 : vector<1x8xf32>
    %18 = arith.negf %17 : vector<1x8xf32>
    %19 = math.exp %18 : vector<1x8xf32>
    %cst = arith.constant 1.000000e+00 : f32
    %20 = vector.broadcast %cst : f32 to vector<1x8xf32>
    %21 = arith.addf %20, %19 : vector<1x8xf32>
    %22 = arith.divf %20, %21 : vector<1x8xf32>
    %23 = vector.broadcast %4 : f32 to vector<1x8xf32>
    %24 = arith.mulf %0, %23 : vector<1x8xf32>
    %25 = vector.broadcast %5 : f32 to vector<1x8xf32>
    %26 = arith.mulf %1, %25 : vector<1x8xf32>
    %27 = arith.addf %24, %26 : vector<1x8xf32>
    %28 = vector.broadcast %7 : f32 to vector<1x8xf32>
    %29 = arith.addf %27, %28 : vector<1x8xf32>
    %30 = arith.negf %29 : vector<1x8xf32>
    %31 = math.exp %30 : vector<1x8xf32>
    %cst_4 = arith.constant 1.000000e+00 : f32
    %32 = vector.broadcast %cst_4 : f32 to vector<1x8xf32>
    %33 = arith.addf %32, %31 : vector<1x8xf32>
    %34 = arith.divf %32, %33 : vector<1x8xf32>
    %35 = vector.broadcast %8 : f32 to vector<1x8xf32>
    %36 = arith.mulf %22, %35 : vector<1x8xf32>
    %37 = vector.broadcast %9 : f32 to vector<1x8xf32>
    %38 = arith.mulf %34, %37 : vector<1x8xf32>
    %39 = arith.addf %36, %38 : vector<1x8xf32>
    %40 = vector.broadcast %10 : f32 to vector<1x8xf32>
    %41 = arith.addf %39, %40 : vector<1x8xf32>
    %c0_5 = arith.constant 0 : index
    %c0_6 = arith.constant 0 : index
    %42 = vector.load %arg2[%c0_5, %c0_6] : memref<1x8xf32, #tpu.memory_space<vmem>>, vector<1x8xf32>
    tpu.vector_store %arg2[%c0_5, %c0_6], %41 {strides = array<i32>} : memref<1x8xf32, #tpu.memory_space<vmem>>, vector<1x8xf32>,
    return
  }
}

</mosaic_0001>

<bundles_post_ra>
// kernel: tpu_custom_call.1
= control target key start
LH: loop header
LB: loop body
LE: loop exit
PB: predicated region body
PF: predicated region fallthrough
CT: control target
= control target key end

     0   :  { %7 = vsyncpa [#allocation5], 0  ;;  %s199_s0 = inlined_call_operand.hbm [shape: f32[9], index: 0, kind: input, shape index: {}]   ;;  %s200_s1 = inlined_call_operand.hbm [shape: f32[2,8], index: 1, kind: input, shape index: {}]   ;;  %s201_s2 = inlined_call_operand.hbm [shape: f32[1,8], index: 2, kind: output, shape index: {}]  }
   0x1   :  { %8 = vsyncpa [#allocation3], 0 }
   0x2   :  { %9 = vsyncpa [#allocation4], 0  ;;  %s172_s9 = smov [#allocation2]   ;;  %s173_s12 = smov [#allocation6]  }
   0x3   :  { %17 = dma.hbm_to_smem %s199_s0, 16, %s172_s9, [#allocation5]  }
   0x4   :  { %s24_s13 = sshll.u32 %s173_s12, 4  ;;  %s25_s13 = int_to_ptr.vmem [resolvable:$true] %s24_s13 }
   0x5   :  { %s134_s14 = scalar_lea.vmem %s25_s13, 32  ;;  %p139_p1 = scmp.lt.s32.totalorder %s25_s13, %s25_s13 }
   0x6   :  { %p135_p0 = scmp.ne.s32.totalorder %s25_s13, %s134_s14  ;;  %p140_p2 = scmp.lt.s32.totalorder %s134_s14, %s134_s14 }
   0x8   :  { %p141_p3 = por %p140_p2, %p139_p1 }
   0xa   :  { %p142_p4 = pnand %p141_p3, %p135_p0 }
   0xc   :  { %145 = shalt.err (!%p142_p4)
}
   0xd   :  { %27 = dma.hbm_to_vmem [thread:$0]  %s200_s1, 32, %s25_s13, [#allocation3]  }
   0xe   :  { %166 = dma.done.wait [#allocation5], 16  }
   0xf   :  { %167 = vsyncadd [#allocation5], 4294967280 }
  0x10   :  { %168 = dma.done.wait [#allocation3], 32  }
  0x11   :  { %169 = vsyncadd [#allocation3], 4294967264 }
  0x12   :  { %34 = sfence }
  0x13   :  { %s37_s0 = sld [smem:[#allocation2]]  ;;  %v35_v0 = vld [vmem:[#allocation6] sm:$0x1]  ;;  %v36_v1 = vld [vmem:[#allocation6 + $0x1] sm:$0x1]  ;;  %s174_s24 = smov [#allocation7]  }
  0x14   :  { %s97_s17 = sld [smem:[#allocation2 + $0x1]]  ;;  %s87_s25 = sshll.u32 %s174_s24, 4  ;;  %vm79_vm0 = vcmask 57344   ;;  %s88_s25 = int_to_ptr.vmem [resolvable:$true] %s87_s25 }
  0x15   :  { %s98_s18 = sld [smem:[#allocation2 + $0x2]]  ;;  %s146_s26 = scalar_lea.vmem %s88_s25, 16 }
  0x16   :  { %s99_s19 = sld [smem:[#allocation2 + $0x3]]  ;;  %p147_p5 = scmp.ne.s32.totalorder %s88_s25, %s146_s26 }
  0x17   :  { %s100_s20 = sld [smem:[#allocation2 + $0x4]]  ;;  %s150_s27 = scalar_lea.vmem %s88_s25, 32 }
  0x18   :  { %s101_s21 = sld [smem:[#allocation2 + $0x5]]  ;;  %p151_p6 = scmp.lt.s32.totalorder %s88_s25, %s88_s25 }
  0x19   :  { %v46_v2 = vstv %s37_s0  ;;  %s102_s1 = sld [smem:[#allocation2 + $0x6]]  ;;  %p152_p7 = scmp.lt.s32.totalorder %s150_s27, %s146_s26 }
  0x1a   :  { %v47_v3 = vmul.f32 %v46_v2, %v35_v0  ;;  %v48_v4 = vstv %s97_s17  ;;  %s103_s22 = sld [smem:[#allocation2 + $0x7]] }
  0x1b   :  { %v49_v5 = vmul.f32 %v48_v4, %v36_v1  ;;  %v59_v6 = vstv %s98_s18  ;;  %s104_s23 = sld [smem:[#allocation2 + $0x8]]  ;;  %p153_p8 = por %p152_p7, %p151_p6 }
  0x1c   :  { %v60_v7 = vmul.f32 %v59_v6, %v35_v0  ;;  %v61_v8 = vstv %s99_s19 }
  0x1d   :  { %v50_v9 = vadd.f32 %v49_v5, %v47_v3  ;;  %v51_v10 = vstv %s100_s20  ;;  %v62_v11 = vmul.f32 %v61_v8, %v36_v1  ;;  %p154_p9 = pnand %p153_p8, %p147_p5 }
  0x1e   :  { %v64_v12 = vstv %s101_s21 }
  0x1f   :  { %v52_v13 = vadd.f32 %v51_v10, %v50_v9  ;;  %v63_v14 = vadd.f32 %v62_v11, %v60_v7  ;;  %v72_v22 = vstv %s102_s1 }
  0x20   :  { %v74_v24 = vstv %s103_s22 }
  0x21   :  { %v105_v15 = vmul.f32 -1.442695, %v52_v13  ;;  %v65_v16 = vadd.f32 %v64_v12, %v63_v14  ;;  %v77_v28 = vstv %s104_s23 }
  0x23   :  { %110 = vpow2.f32 %v105_v15  ;;  %v106_v17 = vmul.f32 -1.442695, %v65_v16 }
  0x25   :  { %112 = vpow2.f32 %v106_v17 }
  0x30   :  { %v111_v18 = vpop.eup %110 }
  0x31   :  { %v56_v19 = vadd.f32 1.0, %v111_v18 }
  0x32   :  { %v113_v20 = vpop.eup %112 }
  0x33   :  { %114 = vrcp.f32 %v56_v19  ;;  %v69_v21 = vadd.f32 1.0, %v113_v20 }
  0x35   :  { %116 = vrcp.f32 %v69_v21 }
  0x40   :  { %v115_v23 = vpop.eup %114 }
  0x41   :  { %v73_v25 = vmul.f32 %v115_v23, %v72_v22 }
  0x42   :  { %v117_v26 = vpop.eup %116 }
  0x43   :  { %v75_v27 = vmul.f32 %v117_v26, %v74_v24 }
  0x45   :  { %v76_v29 = vadd.f32 %v75_v27, %v73_v25 }
  0x47   :  { %v78_v30 = vadd.f32 %v77_v28, %v76_v29 }
  0x49   :  { %80 = vst.msk [vmem:[#allocation7] sm:$0x1] %vm79_vm0, %v78_v30 }
  0x4a   :  { %157 = shalt.err (!%p154_p9)
}
  0x4b   :  { %90 = dma.vmem_to_hbm [thread:$0]  %s88_s25, 16, %s201_s2, [#allocation4]  }
  0x4c   :  { %170 = dma.done.wait [#allocation4], 16  }
  0x4d   :  { %171 = vsyncadd [#allocation4], 4294967280 }
  0x4e   :  { %94 = vsyncpa [#allocation3], 1 }
  0x4f   :  { %95 = vsyncpa [#allocation4], 1 }
  0x50   :  { %96 = vsyncpa [#allocation5], 1 }

</bundles_post_ra>
